<compile_context>
chip_gen: v7x
topology: tpu7x:2x2x1
jax: 0.10.0
libtpu: 0.0.40
codegen_flags: <defaults>
</compile_context>

<pallas_src>
import functools

import jax
import jax.numpy as jnp
from jax.experimental import pallas as pl
from jax.experimental.pallas import tpu as pltpu

LANE = 128
SUBLANE = 8
BATCH_QUANTUM = LANE * SUBLANE            # 1024: keeps every (., nbt, 128) f32 block dense
_TILE_VMEM_BUDGET = 8 * 1024 * 1024       # bytes for double-buffered x+y pipeline buffers


def _round_up(n, m):
    return ((n + m - 1) // m) * m


def net_kernel(w_a_ref, b_a_ref, w_b_ref, b_b_ref, x_ref, o_ref):
    """y = W_b @ sigmoid(W_a @ x + b_a) + b_b on one dense batch tile.

    x_ref:   [inp, nbt, 128]  VMEM (batch spread over sublane x lane -> fully dense)
    o_ref:   [out, nbt, 128]  VMEM
    w_a_ref: [hidden, inp] SMEM, b_a_ref: [hidden] SMEM   (fused input->h1)
    w_b_ref: [out, hidden] SMEM, b_b_ref: [out] SMEM      (fused h2->output)
    """
    inp = x_ref.shape[0]
    hidden = w_a_ref.shape[0]
    out = o_ref.shape[0]

    acc = [None] * out
    for j in range(hidden):                       # unrolled: hidden == 8
        h = x_ref[0] * w_a_ref[j, 0]
        for i in range(1, inp):
            h = h + x_ref[i] * w_a_ref[j, i]
        h = h + b_a_ref[j]
        # sigmoid as a single EUP transcendental (matches XLA's logistic lowering)
        s = 0.5 * jnp.tanh(0.5 * h) + 0.5
        for o in range(out):
            t = s * w_b_ref[o, j]
            acc[o] = t if acc[o] is None else acc[o] + t
    for o in range(out):
        o_ref[o] = (acc[o] + b_b_ref[o]).astype(o_ref.dtype)


def fuse_params(params):
    """Fold the two activation-free layer pairs into single affine maps (f32)."""
    w_in, b_in = params["w_input"], params["b_input"]      # [4, inp], [4]
    w_h1, b_h1 = params["w_h1"], params["b_h1"]            # [8, 4],   [8]
    w_h2, b_h2 = params["w_h2"], params["b_h2"]            # [16, 8],  [16]
    w_out, b_out = params["w_output"], params["b_output"]  # [out,16], [out]

    w_a = (w_h1 @ w_in).astype(jnp.float32)                # [8, inp]
    b_a = (w_h1 @ b_in + b_h1).astype(jnp.float32)         # [8]
    w_b = (w_out @ w_h2).astype(jnp.float32)               # [out, 8]
    b_b = (w_out @ b_h2 + b_out).astype(jnp.float32)       # [out]
    return w_a, b_a, w_b, b_b


def _tiling(batch, inp, out, batch_tile):
    """Pick (batch_tile, padded_batch), both multiples of BATCH_QUANTUM."""
    need = _round_up(max(int(batch), 1), BATCH_QUANTUM)
    if batch_tile is not None:
        cap = _round_up(max(int(batch_tile), BATCH_QUANTUM), BATCH_QUANTUM)
    else:
        # Double-buffered f32 x+y bytes per batch element in the dense 3-D layout.
        per_elem = 2 * 4 * (inp + out)
        cap = max(BATCH_QUANTUM,
                  (_TILE_VMEM_BUDGET // per_elem) // BATCH_QUANTUM * BATCH_QUANTUM)
    n_steps = max(1, pl.cdiv(need, cap))
    # Prefer >=2 grid steps on big single-tile batches so ("parallel",) can span
    # both TensorCores on v7x (harmless on 1-TC v5e/v6e; padding cost <=1024 elems).
    if batch_tile is None and n_steps == 1 and need >= 64 * BATCH_QUANTUM:
        n_steps = 2
    bt = _round_up(pl.cdiv(need, n_steps), BATCH_QUANTUM)
    padded = bt * n_steps
    return bt, padded


@functools.partial(jax.jit, static_argnames=("batch_tile",))
def net_forward_t(x_t, params, *, batch_tile=None):
    """Core entry point: x_t is [inp, batch] (lane-dense layout, no transpose needed).

    Returns y_t: [out, batch] float32.
    """
    inp, batch = x_t.shape
    w_a, b_a, w_b, b_b = fuse_params(params)
    hidden = w_a.shape[0]
    out = w_b.shape[0]

    bt, padded = _tiling(batch, inp, out, batch_tile)
    x_t = x_t.astype(jnp.float32)
    if padded != batch:
        x_t = jnp.pad(x_t, ((0, 0), (0, padded - batch)))

    nb = padded // LANE           # total sublane-rows of batch
    nbt = bt // LANE              # sublane-rows per grid step
    x3 = x_t.reshape(inp, nb, LANE)          # free: contiguous reshape
    grid = (padded // bt,)

    flops = 2 * padded * (inp * hidden + hidden * out)
    transcendentals = padded * hidden
    bytes_accessed = 4 * (padded * (inp + out)
                          + w_a.size + b_a.size + w_b.size + b_b.size)
    vmem_limit = int(min(60 * 2**20, max(32 * 2**20, 96 * bt)))

    smem_spec = pl.BlockSpec(memory_space=pltpu.MemorySpace.SMEM)
    y3 = pl.pallas_call(
        net_kernel,
        out_shape=jax.ShapeDtypeStruct((out, nb, LANE), jnp.float32),
        grid_spec=pltpu.PrefetchScalarGridSpec(
            num_scalar_prefetch=0,
            grid=grid,
            in_specs=[
                smem_spec,                                            # W_a  (SMEM scalars)
                smem_spec,                                            # b_a
                smem_spec,                                            # W_b
                smem_spec,                                            # b_b
                pl.BlockSpec((inp, nbt, LANE), lambda i: (0, i, 0)),  # x (dense, pipelined)
            ],
            out_specs=pl.BlockSpec((out, nbt, LANE), lambda i: (0, i, 0)),
        ),
        compiler_params=pltpu.CompilerParams(
            dimension_semantics=("parallel",),
            vmem_limit_bytes=vmem_limit),
        cost_estimate=pl.CostEstimate(
            flops=flops,
            transcendentals=transcendentals,
            bytes_accessed=bytes_accessed),
    )(w_a, b_a, w_b, b_b, x3)

    return y3.reshape(out, padded)[:, :batch]


@functools.partial(jax.jit, static_argnames=("batch_tile",))
def net_forward(x, params, *, batch_tile=None):
    """PyTorch-convention entry point: x is [batch, inp]. Returns [batch, out] f32.

    Does a single fused layout pass ([batch, inp] -> padded [inp, padded]); callers
    that already hold [inp, batch] data should call `net_forward_t` and skip it.
    """
    batch, inp = x.shape
    out = params["w_output"].shape[0]
    bt, padded = _tiling(batch, inp, out, batch_tile)

    x32 = x.astype(jnp.float32)
    if padded == batch:
        x_t = x32.T                                        # one layout pass, no pad
    else:
        # transpose + pad fused into a single materialization of the padded slab
        x_t = jnp.zeros((inp, padded), jnp.float32).at[:, :batch].set(x32.T)

    y_t = net_forward_t(x_t, params, batch_tile=bt)        # no further padding inside
    return y_t[:, :batch].T


def init_params(key, inp, out):
    """PyTorch nn.Linear default init: W [out_f, in_f], b [out_f], U(-1/sqrt(in), +)."""
    dims = [("input", inp, 4), ("h1", 4, 8), ("h2", 8, 16), ("output", 16, out)]
    params = {}
    keys = jax.random.split(key, 2 * len(dims))
    for i, (name, d_in, d_out) in enumerate(dims):
        bound = 1.0 / jnp.sqrt(jnp.float32(d_in))
        params[f"w_{name}"] = jax.random.uniform(
            keys[2 * i], (d_out, d_in), jnp.float32, -bound, bound)
        params[f"b_{name}"] = jax.random.uniform(
            keys[2 * i + 1], (d_out,), jnp.float32, -bound, bound)
    return params


def net_forward_ref(x, params):
    """Pure-JAX reference of the unfused PyTorch forward."""
    h = x @ params["w_input"].T + params["b_input"]
    h = jax.nn.sigmoid(h @ params["w_h1"].T + params["b_h1"])
    h = h @ params["w_h2"].T + params["b_h2"]
    h = h @ params["w_output"].T + params["b_output"]
    return h


if __name__ == "__main__":
    key = jax.random.PRNGKey(0)
    inp, out = 3, 1  # implied by the script's 4x3 input tensor
    params = init_params(key, inp, out)

    # Same input as the PyTorch script's `x` tensor: [4, 3] float32.
    x = jnp.array([[0, 0, 1],
                   [0, 1, 1],
                   [1, 0, 1],
                   [1, 1, 1]], dtype=jnp.float32)

    y = jax.block_until_ready(net_forward(x, params))
    y_ref = net_forward_ref(x, params)
    assert y.shape == (4, out), y.shape
    assert jnp.allclose(y, y_ref, atol=1e-5, rtol=1e-5), (y, y_ref)

    # Non-aligned batch exercising the pad path (single grid step).
    xb = jax.random.uniform(jax.random.PRNGKey(1), (300, inp), jnp.float32, -1.0, 1.0)
    yb = jax.block_until_ready(net_forward(xb, params))
    assert yb.shape == (300, out), yb.shape
    assert jnp.allclose(yb, net_forward_ref(xb, params), atol=1e-5, rtol=1e-5)

    # Multi-step grid + ragged tail with a small explicit tile (pipelined path).
    xc = jax.random.uniform(jax.random.PRNGKey(2), (2500, inp), jnp.float32, -1.0, 1.0)
    yc = jax.block_until_ready(net_forward(xc, params, batch_tile=1024))
    assert yc.shape == (2500, out), yc.shape
    assert jnp.allclose(yc, net_forward_ref(xc, params), atol=1e-5, rtol=1e-5)

    # Transposed-layout entry point (zero wrapper layout traffic).
    yt = jax.block_until_ready(net_forward_t(xb.T, params))
    assert jnp.allclose(yt.T, net_forward_ref(xb, params), atol=1e-5, rtol=1e-5)

    # TODO(synk): training loop / optimizer / SummaryWriter from the script are
    # host-side concerns, intentionally not part of the forward kernel.
    print("KERNEL_OK")
</pallas_src>

<mosaic_0001>
module attributes {stable_mosaic.version = 11 : i64} {
  func.func @net_kernel(%arg0: i32, %arg1: memref<8x3xf32, #tpu.memory_space<smem>>, %arg2: memref<8xf32, #tpu.memory_space<smem>>, %arg3: memref<1x8xf32, #tpu.memory_space<smem>>, %arg4: memref<1xf32, #tpu.memory_space<smem>>, %arg5: memref<3x8x128xf32, #tpu.memory_space<vmem>>, %arg6: memref<1x8x128xf32, #tpu.memory_space<vmem>>) attributes {dimension_semantics = [#tpu.dimension_semantics<parallel>], iteration_bounds = array<i64: 1>, scalar_prefetch = 0 : i64, scratch_operands = 0 : i64, tpu.core_type = #tpu.core_type<tc>, window_params = [{transform_indices = @transform_0, window_bounds = array<i64: 8, 3>}, {transform_indices = @transform_1, window_bounds = array<i64: 8>}, {transform_indices = @transform_2, window_bounds = array<i64: 1, 8>}, {transform_indices = @transform_3, window_bounds = array<i64: 1>}, {transform_indices = @transform_4, window_bounds = array<i64: 3, 8, 128>}, {transform_indices = @transform_5, window_bounds = array<i64: 1, 8, 128>}]} {
    %c0 = arith.constant 0 : index
    %c0_0 = arith.constant 0 : index
    %c0_1 = arith.constant 0 : index
    %0 = vector.load %arg5[%c0, %c0_0, %c0_1] : memref<3x8x128xf32, #tpu.memory_space<vmem>>, vector<1x8x128xf32>
    %1 = vector.shape_cast %0 : vector<1x8x128xf32> to vector<8x128xf32>
    %c0_2 = arith.constant 0 : index
    %c0_3 = arith.constant 0 : index
    %2 = memref.load %arg1[%c0_2, %c0_3] : memref<8x3xf32, #tpu.memory_space<smem>>
    %3 = vector.broadcast %2 : f32 to vector<8x128xf32>
    %4 = arith.mulf %1, %3 : vector<8x128xf32>
    %c1 = arith.constant 1 : index
    %c0_4 = arith.constant 0 : index
    %c0_5 = arith.constant 0 : index
    %5 = vector.load %arg5[%c1, %c0_4, %c0_5] : memref<3x8x128xf32, #tpu.memory_space<vmem>>, vector<1x8x128xf32>
    %6 = vector.shape_cast %5 : vector<1x8x128xf32> to vector<8x128xf32>
    %c0_6 = arith.constant 0 : index
    %c1_7 = arith.constant 1 : index
    %7 = memref.load %arg1[%c0_6, %c1_7] : memref<8x3xf32, #tpu.memory_space<smem>>
    %8 = vector.broadcast %7 : f32 to vector<8x128xf32>
    %9 = arith.mulf %6, %8 : vector<8x128xf32>
    %10 = arith.addf %4, %9 : vector<8x128xf32>
    %c2 = arith.constant 2 : index
    %c0_8 = arith.constant 0 : index
    %c0_9 = arith.constant 0 : index
    %11 = vector.load %arg5[%c2, %c0_8, %c0_9] : memref<3x8x128xf32, #tpu.memory_space<vmem>>, vector<1x8x128xf32>
    %12 = vector.shape_cast %11 : vector<1x8x128xf32> to vector<8x128xf32>
    %c0_10 = arith.constant 0 : index
    %c2_11 = arith.constant 2 : index
    %13 = memref.load %arg1[%c0_10, %c2_11] : memref<8x3xf32, #tpu.memory_space<smem>>
    %14 = vector.broadcast %13 : f32 to vector<8x128xf32>
    %15 = arith.mulf %12, %14 : vector<8x128xf32>
    %16 = arith.addf %10, %15 : vector<8x128xf32>
    %c0_12 = arith.constant 0 : index
    %17 = memref.load %arg2[%c0_12] : memref<8xf32, #tpu.memory_space<smem>>
    %18 = vector.broadcast %17 : f32 to vector<8x128xf32>
    %19 = arith.addf %16, %18 : vector<8x128xf32>
    %cst = arith.constant 5.000000e-01 : f32
    %20 = vector.broadcast %cst : f32 to vector<8x128xf32>
    %21 = arith.mulf %20, %19 : vector<8x128xf32>
    %22 = math.tanh %21 : vector<8x128xf32>
    %cst_13 = arith.constant 5.000000e-01 : f32
    %23 = vector.broadcast %cst_13 : f32 to vector<8x128xf32>
    %24 = arith.mulf %23, %22 : vector<8x128xf32>
    %cst_14 = arith.constant 5.000000e-01 : f32
    %25 = vector.broadcast %cst_14 : f32 to vector<8x128xf32>
    %26 = arith.addf %24, %25 : vector<8x128xf32>
    %c0_15 = arith.constant 0 : index
    %c0_16 = arith.constant 0 : index
    %27 = memref.load %arg3[%c0_15, %c0_16] : memref<1x8xf32, #tpu.memory_space<smem>>
    %28 = vector.broadcast %27 : f32 to vector<8x128xf32>
    %29 = arith.mulf %26, %28 : vector<8x128xf32>
    %c0_17 = arith.constant 0 : index
    %c0_18 = arith.constant 0 : index
    %c0_19 = arith.constant 0 : index
    %30 = vector.load %arg5[%c0_17, %c0_18, %c0_19] : memref<3x8x128xf32, #tpu.memory_space<vmem>>, vector<1x8x128xf32>
    %31 = vector.shape_cast %30 : vector<1x8x128xf32> to vector<8x128xf32>
    %c1_20 = arith.constant 1 : index
    %c0_21 = arith.constant 0 : index
    %32 = memref.load %arg1[%c1_20, %c0_21] : memref<8x3xf32, #tpu.memory_space<smem>>
    %33 = vector.broadcast %32 : f32 to vector<8x128xf32>
    %34 = arith.mulf %31, %33 : vector<8x128xf32>
    %c1_22 = arith.constant 1 : index
    %c0_23 = arith.constant 0 : index
    %c0_24 = arith.constant 0 : index
    %35 = vector.load %arg5[%c1_22, %c0_23, %c0_24] : memref<3x8x128xf32, #tpu.memory_space<vmem>>, vector<1x8x128xf32>
    %36 = vector.shape_cast %35 : vector<1x8x128xf32> to vector<8x128xf32>
    %c1_25 = arith.constant 1 : index
    %c1_26 = arith.constant 1 : index
    %37 = memref.load %arg1[%c1_25, %c1_26] : memref<8x3xf32, #tpu.memory_space<smem>>
    %38 = vector.broadcast %37 : f32 to vector<8x128xf32>
    %39 = arith.mulf %36, %38 : vector<8x128xf32>
    %40 = arith.addf %34, %39 : vector<8x128xf32>
    %c2_27 = arith.constant 2 : index
    %c0_28 = arith.constant 0 : index
    %c0_29 = arith.constant 0 : index
    %41 = vector.load %arg5[%c2_27, %c0_28, %c0_29] : memref<3x8x128xf32, #tpu.memory_space<vmem>>, vector<1x8x128xf32>
    %42 = vector.shape_cast %41 : vector<1x8x128xf32> to vector<8x128xf32>
    %c1_30 = arith.constant 1 : index
    %c2_31 = arith.constant 2 : index
    %43 = memref.load %arg1[%c1_30, %c2_31] : memref<8x3xf32, #tpu.memory_space<smem>>
    %44 = vector.broadcast %43 : f32 to vector<8x128xf32>
    %45 = arith.mulf %42, %44 : vector<8x128xf32>
    %46 = arith.addf %40, %45 : vector<8x128xf32>
    %c1_32 = arith.constant 1 : index
    %47 = memref.load %arg2[%c1_32] : memref<8xf32, #tpu.memory_space<smem>>
    %48 = vector.broadcast %47 : f32 to vector<8x128xf32>
    %49 = arith.addf %46, %48 : vector<8x128xf32>
    %cst_33 = arith.constant 5.000000e-01 : f32
    %50 = vector.broadcast %cst_33 : f32 to vector<8x128xf32>
    %51 = arith.mulf %50, %49 : vector<8x128xf32>
    %52 = math.tanh %51 : vector<8x128xf32>
    %cst_34 = arith.constant 5.000000e-01 : f32
    %53 = vector.broadcast %cst_34 : f32 to vector<8x128xf32>
    %54 = arith.mulf %53, %52 : vector<8x128xf32>
    %cst_35 = arith.constant 5.000000e-01 : f32
    %55 = vector.broadcast %cst_35 : f32 to vector<8x128xf32>
    %56 = arith.addf %54, %55 : vector<8x128xf32>
    %c0_36 = arith.constant 0 : index
    %c1_37 = arith.constant 1 : index
    %57 = memref.load %arg3[%c0_36, %c1_37] : memref<1x8xf32, #tpu.memory_space<smem>>
    %58 = vector.broadcast %57 : f32 to vector<8x128xf32>
    %59 = arith.mulf %56, %58 : vector<8x128xf32>
    %60 = arith.addf %29, %59 : vector<8x128xf32>
    %c0_38 = arith.constant 0 : index
    %c0_39 = arith.constant 0 : index
    %c0_40 = arith.constant 0 : index
    %61 = vector.load %arg5[%c0_38, %c0_39, %c0_40] : memref<3x8x128xf32, #tpu.memory_space<vmem>>, vector<1x8x128xf32>
    %62 = vector.shape_cast %61 : vector<1x8x128xf32> to vector<8x128xf32>
    %c2_41 = arith.constant 2 : index
    %c0_42 = arith.constant 0 : index
    %63 = memref.load %arg1[%c2_41, %c0_42] : memref<8x3xf32, #tpu.memory_space<smem>>
    %64 = vector.broadcast %63 : f32 to vector<8x128xf32>
    %65 = arith.mulf %62, %64 : vector<8x128xf32>
    %c1_43 = arith.constant 1 : index
    %c0_44 = arith.constant 0 : index
    %c0_45 = arith.constant 0 : index
    %66 = vector.load %arg5[%c1_43, %c0_44, %c0_45] : memref<3x8x128xf32, #tpu.memory_space<vmem>>, vector<1x8x128xf32>
    %67 = vector.shape_cast %66 : vector<1x8x128xf32> to vector<8x128xf32>
    %c2_46 = arith.constant 2 : index
    %c1_47 = arith.constant 1 : index
    %68 = memref.load %arg1[%c2_46, %c1_47] : memref<8x3xf32, #tpu.memory_space<smem>>
    %69 = vector.broadcast %68 : f32 to vector<8x128xf32>
    %70 = arith.mulf %67, %69 : vector<8x128xf32>
    %71 = arith.addf %65, %70 : vector<8x128xf32>
    %c2_48 = arith.constant 2 : index
    %c0_49 = arith.constant 0 : index
    %c0_50 = arith.constant 0 : index
    %72 = vector.load %arg5[%c2_48, %c0_49, %c0_50] : memref<3x8x128xf32, #tpu.memory_space<vmem>>, vector<1x8x128xf32>
    %73 = vector.shape_cast %72 : vector<1x8x128xf32> to vector<8x128xf32>
    %c2_51 = arith.constant 2 : index
    %c2_52 = arith.constant 2 : index
    %74 = memref.load %arg1[%c2_51, %c2_52] : memref<8x3xf32, #tpu.memory_space<smem>>
    %75 = vector.broadcast %74 : f32 to vector<8x128xf32>
    %76 = arith.mulf %73, %75 : vector<8x128xf32>
    %77 = arith.addf %71, %76 : vector<8x128xf32>
    %c2_53 = arith.constant 2 : index
    %78 = memref.load %arg2[%c2_53] : memref<8xf32, #tpu.memory_space<smem>>
    %79 = vector.broadcast %78 : f32 to vector<8x128xf32>
    %80 = arith.addf %77, %79 : vector<8x128xf32>
    %cst_54 = arith.constant 5.000000e-01 : f32
    %81 = vector.broadcast %cst_54 : f32 to vector<8x128xf32>
    %82 = arith.mulf %81, %80 : vector<8x128xf32>
    %83 = math.tanh %82 : vector<8x128xf32>
    %cst_55 = arith.constant 5.000000e-01 : f32
    %84 = vector.broadcast %cst_55 : f32 to vector<8x128xf32>
    %85 = arith.mulf %84, %83 : vector<8x128xf32>
    %cst_56 = arith.constant 5.000000e-01 : f32
    %86 = vector.broadcast %cst_56 : f32 to vector<8x128xf32>
    %87 = arith.addf %85, %86 : vector<8x128xf32>
    %c0_57 = arith.constant 0 : index
    %c2_58 = arith.constant 2 : index
    %88 = memref.load %arg3[%c0_57, %c2_58] : memref<1x8xf32, #tpu.memory_space<smem>>
    %89 = vector.broadcast %88 : f32 to vector<8x128xf32>
    %90 = arith.mulf %87, %89 : vector<8x128xf32>
    %91 = arith.addf %60, %90 : vector<8x128xf32>
    %c0_59 = arith.constant 0 : index
    %c0_60 = arith.constant 0 : index
    %c0_61 = arith.constant 0 : index
    %92 = vector.load %arg5[%c0_59, %c0_60, %c0_61] : memref<3x8x128xf32, #tpu.memory_space<vmem>>, vector<1x8x128xf32>
    %93 = vector.shape_cast %92 : vector<1x8x128xf32> to vector<8x128xf32>
    %c3 = arith.constant 3 : index
    %c0_62 = arith.constant 0 : index
    %94 = memref.load %arg1[%c3, %c0_62] : memref<8x3xf32, #tpu.memory_space<smem>>
    %95 = vector.broadcast %94 : f32 to vector<8x128xf32>
    %96 = arith.mulf %93, %95 : vector<8x128xf32>
    %c1_63 = arith.constant 1 : index
    %c0_64 = arith.constant 0 : index
    %c0_65 = arith.constant 0 : index
    %97 = vector.load %arg5[%c1_63, %c0_64, %c0_65] : memref<3x8x128xf32, #tpu.memory_space<vmem>>, vector<1x8x128xf32>
    %98 = vector.shape_cast %97 : vector<1x8x128xf32> to vector<8x128xf32>
    %c3_66 = arith.constant 3 : index
    %c1_67 = arith.constant 1 : index
    %99 = memref.load %arg1[%c3_66, %c1_67] : memref<8x3xf32, #tpu.memory_space<smem>>
    %100 = vector.broadcast %99 : f32 to vector<8x128xf32>
    %101 = arith.mulf %98, %100 : vector<8x128xf32>
    %102 = arith.addf %96, %101 : vector<8x128xf32>
    %c2_68 = arith.constant 2 : index
    %c0_69 = arith.constant 0 : index
    %c0_70 = arith.constant 0 : index
    %103 = vector.load %arg5[%c2_68, %c0_69, %c0_70] : memref<3x8x128xf32, #tpu.memory_space<vmem>>, vector<1x8x128xf32>
    %104 = vector.shape_cast %103 : vector<1x8x128xf32> to vector<8x128xf32>
    %c3_71 = arith.constant 3 : index
    %c2_72 = arith.constant 2 : index
    %105 = memref.load %arg1[%c3_71, %c2_72] : memref<8x3xf32, #tpu.memory_space<smem>>
    %106 = vector.broadcast %105 : f32 to vector<8x128xf32>
    %107 = arith.mulf %104, %106 : vector<8x128xf32>
    %108 = arith.addf %102, %107 : vector<8x128xf32>
    %c3_73 = arith.constant 3 : index
    %109 = memref.load %arg2[%c3_73] : memref<8xf32, #tpu.memory_space<smem>>
    %110 = vector.broadcast %109 : f32 to vector<8x128xf32>
    %111 = arith.addf %108, %110 : vector<8x128xf32>
    %cst_74 = arith.constant 5.000000e-01 : f32
    %112 = vector.broadcast %cst_74 : f32 to vector<8x128xf32>
    %113 = arith.mulf %112, %111 : vector<8x128xf32>
    %114 = math.tanh %113 : vector<8x128xf32>
    %cst_75 = arith.constant 5.000000e-01 : f32
    %115 = vector.broadcast %cst_75 : f32 to vector<8x128xf32>
    %116 = arith.mulf %115, %114 : vector<8x128xf32>
    %cst_76 = arith.constant 5.000000e-01 : f32
    %117 = vector.broadcast %cst_76 : f32 to vector<8x128xf32>
    %118 = arith.addf %116, %117 : vector<8x128xf32>
    %c0_77 = arith.constant 0 : index
    %c3_78 = arith.constant 3 : index
    %119 = memref.load %arg3[%c0_77, %c3_78] : memref<1x8xf32, #tpu.memory_space<smem>>
    %120 = vector.broadcast %119 : f32 to vector<8x128xf32>
    %121 = arith.mulf %118, %120 : vector<8x128xf32>
    %122 = arith.addf %91, %121 : vector<8x128xf32>
    %c0_79 = arith.constant 0 : index
    %c0_80 = arith.constant 0 : index
    %c0_81 = arith.constant 0 : index
    %123 = vector.load %arg5[%c0_79, %c0_80, %c0_81] : memref<3x8x128xf32, #tpu.memory_space<vmem>>, vector<1x8x128xf32>
    %124 = vector.shape_cast %123 : vector<1x8x128xf32> to vector<8x128xf32>
    %c4 = arith.constant 4 : index
    %c0_82 = arith.constant 0 : index
    %125 = memref.load %arg1[%c4, %c0_82] : memref<8x3xf32, #tpu.memory_space<smem>>
    %126 = vector.broadcast %125 : f32 to vector<8x128xf32>
    %127 = arith.mulf %124, %126 : vector<8x128xf32>
    %c1_83 = arith.constant 1 : index
    %c0_84 = arith.constant 0 : index
    %c0_85 = arith.constant 0 : index
    %128 = vector.load %arg5[%c1_83, %c0_84, %c0_85] : memref<3x8x128xf32, #tpu.memory_space<vmem>>, vector<1x8x128xf32>
    %129 = vector.shape_cast %128 : vector<1x8x128xf32> to vector<8x128xf32>
    %c4_86 = arith.constant 4 : index
    %c1_87 = arith.constant 1 : index
    %130 = memref.load %arg1[%c4_86, %c1_87] : memref<8x3xf32, #tpu.memory_space<smem>>
    %131 = vector.broadcast %130 : f32 to vector<8x128xf32>
    %132 = arith.mulf %129, %131 : vector<8x128xf32>
    %133 = arith.addf %127, %132 : vector<8x128xf32>
    %c2_88 = arith.constant 2 : index
    %c0_89 = arith.constant 0 : index
    %c0_90 = arith.constant 0 : index
    %134 = vector.load %arg5[%c2_88, %c0_89, %c0_90] : memref<3x8x128xf32, #tpu.memory_space<vmem>>, vector<1x8x128xf32>
    %135 = vector.shape_cast %134 : vector<1x8x128xf32> to vector<8x128xf32>
    %c4_91 = arith.constant 4 : index
    %c2_92 = arith.constant 2 : index
    %136 = memref.load %arg1[%c4_91, %c2_92] : memref<8x3xf32, #tpu.memory_space<smem>>
    %137 = vector.broadcast %136 : f32 to vector<8x128xf32>
    %138 = arith.mulf %135, %137 : vector<8x128xf32>
    %139 = arith.addf %133, %138 : vector<8x128xf32>
    %c4_93 = arith.constant 4 : index
    %140 = memref.load %arg2[%c4_93] : memref<8xf32, #tpu.memory_space<smem>>
    %141 = vector.broadcast %140 : f32 to vector<8x128xf32>
    %142 = arith.addf %139, %141 : vector<8x128xf32>
    %cst_94 = arith.constant 5.000000e-01 : f32
    %143 = vector.broadcast %cst_94 : f32 to vector<8x128xf32>
    %144 = arith.mulf %143, %142 : vector<8x128xf32>
    %145 = math.tanh %144 : vector<8x128xf32>
    %cst_95 = arith.constant 5.000000e-01 : f32
    %146 = vector.broadcast %cst_95 : f32 to vector<8x128xf32>
    %147 = arith.mulf %146, %145 : vector<8x128xf32>
    %cst_96 = arith.constant 5.000000e-01 : f32
    %148 = vector.broadcast %cst_96 : f32 to vector<8x128xf32>
    %149 = arith.addf %147, %148 : vector<8x128xf32>
    %c0_97 = arith.constant 0 : index
    %c4_98 = arith.constant 4 : index
    %150 = memref.load %arg3[%c0_97, %c4_98] : memref<1x8xf32, #tpu.memory_space<smem>>
    %151 = vector.broadcast %150 : f32 to vector<8x128xf32>
    %152 = arith.mulf %149, %151 : vector<8x128xf32>
    %153 = arith.addf %122, %152 : vector<8x128xf32>
    %c0_99 = arith.constant 0 : index
    %c0_100 = arith.constant 0 : index
    %c0_101 = arith.constant 0 : index
    %154 = vector.load %arg5[%c0_99, %c0_100, %c0_101] : memref<3x8x128xf32, #tpu.memory_space<vmem>>, vector<1x8x128xf32>
    %155 = vector.shape_cast %154 : vector<1x8x128xf32> to vector<8x128xf32>
    %c5 = arith.constant 5 : index
    %c0_102 = arith.constant 0 : index
    %156 = memref.load %arg1[%c5, %c0_102] : memref<8x3xf32, #tpu.memory_space<smem>>
    %157 = vector.broadcast %156 : f32 to vector<8x128xf32>
    %158 = arith.mulf %155, %157 : vector<8x128xf32>
    %c1_103 = arith.constant 1 : index
    %c0_104 = arith.constant 0 : index
    %c0_105 = arith.constant 0 : index
    %159 = vector.load %arg5[%c1_103, %c0_104, %c0_105] : memref<3x8x128xf32, #tpu.memory_space<vmem>>, vector<1x8x128xf32>
    %160 = vector.shape_cast %159 : vector<1x8x128xf32> to vector<8x128xf32>
    %c5_106 = arith.constant 5 : index
    %c1_107 = arith.constant 1 : index
    %161 = memref.load %arg1[%c5_106, %c1_107] : memref<8x3xf32, #tpu.memory_space<smem>>
    %162 = vector.broadcast %161 : f32 to vector<8x128xf32>
    %163 = arith.mulf %160, %162 : vector<8x128xf32>
    %164 = arith.addf %158, %163 : vector<8x128xf32>
    %c2_108 = arith.constant 2 : index
    %c0_109 = arith.constant 0 : index
    %c0_110 = arith.constant 0 : index
    %165 = vector.load %arg5[%c2_108, %c0_109, %c0_110] : memref<3x8x128xf32, #tpu.memory_space<vmem>>, vector<1x8x128xf32>
    %166 = vector.shape_cast %165 : vector<1x8x128xf32> to vector<8x128xf32>
    %c5_111 = arith.constant 5 : index
    %c2_112 = arith.constant 2 : index
    %167 = memref.load %arg1[%c5_111, %c2_112] : memref<8x3xf32, #tpu.memory_space<smem>>
    %168 = vector.broadcast %167 : f32 to vector<8x128xf32>
    %169 = arith.mulf %166, %168 : vector<8x128xf32>
    %170 = arith.addf %164, %169 : vector<8x128xf32>
    %c5_113 = arith.constant 5 : index
    %171 = memref.load %arg2[%c5_113] : memref<8xf32, #tpu.memory_space<smem>>
    %172 = vector.broadcast %171 : f32 to vector<8x128xf32>
    %173 = arith.addf %170, %172 : vector<8x128xf32>
    %cst_114 = arith.constant 5.000000e-01 : f32
    %174 = vector.broadcast %cst_114 : f32 to vector<8x128xf32>
    %175 = arith.mulf %174, %173 : vector<8x128xf32>
    %176 = math.tanh %175 : vector<8x128xf32>
    %cst_115 = arith.constant 5.000000e-01 : f32
    %177 = vector.broadcast %cst_115 : f32 to vector<8x128xf32>
    %178 = arith.mulf %177, %176 : vector<8x128xf32>
    %cst_116 = arith.constant 5.000000e-01 : f32
    %179 = vector.broadcast %cst_116 : f32 to vector<8x128xf32>
    %180 = arith.addf %178, %179 : vector<8x128xf32>
    %c0_117 = arith.constant 0 : index
    %c5_118 = arith.constant 5 : index
    %181 = memref.load %arg3[%c0_117, %c5_118] : memref<1x8xf32, #tpu.memory_space<smem>>
    %182 = vector.broadcast %181 : f32 to vector<8x128xf32>
    %183 = arith.mulf %180, %182 : vector<8x128xf32>
    %184 = arith.addf %153, %183 : vector<8x128xf32>
    %c0_119 = arith.constant 0 : index
    %c0_120 = arith.constant 0 : index
    %c0_121 = arith.constant 0 : index
    %185 = vector.load %arg5[%c0_119, %c0_120, %c0_121] : memref<3x8x128xf32, #tpu.memory_space<vmem>>, vector<1x8x128xf32>
    %186 = vector.shape_cast %185 : vector<1x8x128xf32> to vector<8x128xf32>
    %c6 = arith.constant 6 : index
    %c0_122 = arith.constant 0 : index
    %187 = memref.load %arg1[%c6, %c0_122] : memref<8x3xf32, #tpu.memory_space<smem>>
    %188 = vector.broadcast %187 : f32 to vector<8x128xf32>
    %189 = arith.mulf %186, %188 : vector<8x128xf32>
    %c1_123 = arith.constant 1 : index
    %c0_124 = arith.constant 0 : index
    %c0_125 = arith.constant 0 : index
    %190 = vector.load %arg5[%c1_123, %c0_124, %c0_125] : memref<3x8x128xf32, #tpu.memory_space<vmem>>, vector<1x8x128xf32>
    %191 = vector.shape_cast %190 : vector<1x8x128xf32> to vector<8x128xf32>
    %c6_126 = arith.constant 6 : index
    %c1_127 = arith.constant 1 : index
    %192 = memref.load %arg1[%c6_126, %c1_127] : memref<8x3xf32, #tpu.memory_space<smem>>
    %193 = vector.broadcast %192 : f32 to vector<8x128xf32>
    %194 = arith.mulf %191, %193 : vector<8x128xf32>
    %195 = arith.addf %189, %194 : vector<8x128xf32>
    %c2_128 = arith.constant 2 : index
    %c0_129 = arith.constant 0 : index
    %c0_130 = arith.constant 0 : index
    %196 = vector.load %arg5[%c2_128, %c0_129, %c0_130] : memref<3x8x128xf32, #tpu.memory_space<vmem>>, vector<1x8x128xf32>
    %197 = vector.shape_cast %196 : vector<1x8x128xf32> to vector<8x128xf32>
    %c6_131 = arith.constant 6 : index
    %c2_132 = arith.constant 2 : index
    %198 = memref.load %arg1[%c6_131, %c2_132] : memref<8x3xf32, #tpu.memory_space<smem>>
    %199 = vector.broadcast %198 : f32 to vector<8x128xf32>
    %200 = arith.mulf %197, %199 : vector<8x128xf32>
    %201 = arith.addf %195, %200 : vector<8x128xf32>
    %c6_133 = arith.constant 6 : index
    %202 = memref.load %arg2[%c6_133] : memref<8xf32, #tpu.memory_space<smem>>
    %203 = vector.broadcast %202 : f32 to vector<8x128xf32>
    %204 = arith.addf %201, %203 : vector<8x128xf32>
    %cst_134 = arith.constant 5.000000e-01 : f32
    %205 = vector.broadcast %cst_134 : f32 to vector<8x128xf32>
    %206 = arith.mulf %205, %204 : vector<8x128xf32>
    %207 = math.tanh %206 : vector<8x128xf32>
    %cst_135 = arith.constant 5.000000e-01 : f32
    %208 = vector.broadcast %cst_135 : f32 to vector<8x128xf32>
    %209 = arith.mulf %208, %207 : vector<8x128xf32>
    %cst_136 = arith.constant 5.000000e-01 : f32
    %210 = vector.broadcast %cst_136 : f32 to vector<8x128xf32>
    %211 = arith.addf %209, %210 : vector<8x128xf32>
    %c0_137 = arith.constant 0 : index
    %c6_138 = arith.constant 6 : index
    %212 = memref.load %arg3[%c0_137, %c6_138] : memref<1x8xf32, #tpu.memory_space<smem>>
    %213 = vector.broadcast %212 : f32 to vector<8x128xf32>
    %214 = arith.mulf %211, %213 : vector<8x128xf32>
    %215 = arith.addf %184, %214 : vector<8x128xf32>
    %c0_139 = arith.constant 0 : index
    %c0_140 = arith.constant 0 : index
    %c0_141 = arith.constant 0 : index
    %216 = vector.load %arg5[%c0_139, %c0_140, %c0_141] : memref<3x8x128xf32, #tpu.memory_space<vmem>>, vector<1x8x128xf32>
    %217 = vector.shape_cast %216 : vector<1x8x128xf32> to vector<8x128xf32>
    %c7 = arith.constant 7 : index
    %c0_142 = arith.constant 0 : index
    %218 = memref.load %arg1[%c7, %c0_142] : memref<8x3xf32, #tpu.memory_space<smem>>
    %219 = vector.broadcast %218 : f32 to vector<8x128xf32>
    %220 = arith.mulf %217, %219 : vector<8x128xf32>
    %c1_143 = arith.constant 1 : index
    %c0_144 = arith.constant 0 : index
    %c0_145 = arith.constant 0 : index
    %221 = vector.load %arg5[%c1_143, %c0_144, %c0_145] : memref<3x8x128xf32, #tpu.memory_space<vmem>>, vector<1x8x128xf32>
    %222 = vector.shape_cast %221 : vector<1x8x128xf32> to vector<8x128xf32>
    %c7_146 = arith.constant 7 : index
    %c1_147 = arith.constant 1 : index
    %223 = memref.load %arg1[%c7_146, %c1_147] : memref<8x3xf32, #tpu.memory_space<smem>>
    %224 = vector.broadcast %223 : f32 to vector<8x128xf32>
    %225 = arith.mulf %222, %224 : vector<8x128xf32>
    %226 = arith.addf %220, %225 : vector<8x128xf32>
    %c2_148 = arith.constant 2 : index
    %c0_149 = arith.constant 0 : index
    %c0_150 = arith.constant 0 : index
    %227 = vector.load %arg5[%c2_148, %c0_149, %c0_150] : memref<3x8x128xf32, #tpu.memory_space<vmem>>, vector<1x8x128xf32>
    %228 = vector.shape_cast %227 : vector<1x8x128xf32> to vector<8x128xf32>
    %c7_151 = arith.constant 7 : index
    %c2_152 = arith.constant 2 : index
    %229 = memref.load %arg1[%c7_151, %c2_152] : memref<8x3xf32, #tpu.memory_space<smem>>
    %230 = vector.broadcast %229 : f32 to vector<8x128xf32>
    %231 = arith.mulf %228, %230 : vector<8x128xf32>
    %232 = arith.addf %226, %231 : vector<8x128xf32>
    %c7_153 = arith.constant 7 : index
    %233 = memref.load %arg2[%c7_153] : memref<8xf32, #tpu.memory_space<smem>>
    %234 = vector.broadcast %233 : f32 to vector<8x128xf32>
    %235 = arith.addf %232, %234 : vector<8x128xf32>
    %cst_154 = arith.constant 5.000000e-01 : f32
    %236 = vector.broadcast %cst_154 : f32 to vector<8x128xf32>
    %237 = arith.mulf %236, %235 : vector<8x128xf32>
    %238 = math.tanh %237 : vector<8x128xf32>
    %cst_155 = arith.constant 5.000000e-01 : f32
    %239 = vector.broadcast %cst_155 : f32 to vector<8x128xf32>
    %240 = arith.mulf %239, %238 : vector<8x128xf32>
    %cst_156 = arith.constant 5.000000e-01 : f32
    %241 = vector.broadcast %cst_156 : f32 to vector<8x128xf32>
    %242 = arith.addf %240, %241 : vector<8x128xf32>
    %c0_157 = arith.constant 0 : index
    %c7_158 = arith.constant 7 : index
    %243 = memref.load %arg3[%c0_157, %c7_158] : memref<1x8xf32, #tpu.memory_space<smem>>
    %244 = vector.broadcast %243 : f32 to vector<8x128xf32>
    %245 = arith.mulf %242, %244 : vector<8x128xf32>
    %246 = arith.addf %215, %245 : vector<8x128xf32>
    %c0_159 = arith.constant 0 : index
    %247 = memref.load %arg4[%c0_159] : memref<1xf32, #tpu.memory_space<smem>>
    %248 = vector.broadcast %247 : f32 to vector<8x128xf32>
    %249 = arith.addf %246, %248 : vector<8x128xf32>
    %c0_160 = arith.constant 0 : index
    %c0_161 = arith.constant 0 : index
    %c0_162 = arith.constant 0 : index
    %250 = vector.load %arg6[%c0_160, %c0_161, %c0_162] : memref<1x8x128xf32, #tpu.memory_space<vmem>>, vector<1x8x128xf32>
    %251 = vector.shape_cast %250 : vector<1x8x128xf32> to vector<8x128xf32>
    %252 = vector.shape_cast %249 : vector<8x128xf32> to vector<1x8x128xf32>
    tpu.vector_store %arg6[%c0_160, %c0_161, %c0_162], %252 {strides = array<i32>} : memref<1x8x128xf32, #tpu.memory_space<vmem>>, vector<1x8x128xf32>,
    return
  }
  func.func @transform_0(%arg0: i32) -> (i32, i32) {
    %c0_i32 = arith.constant 0 : i32
    %c0_i32_0 = arith.constant 0 : i32
    %c0_i32_1 = arith.constant 0 : i32
    return %c0_i32, %c0_i32_0 : i32, i32
  }
  func.func @transform_1(%arg0: i32) -> i32 {
    %c0_i32 = arith.constant 0 : i32
    %c0_i32_0 = arith.constant 0 : i32
    return %c0_i32 : i32
  }
  func.func @transform_2(%arg0: i32) -> (i32, i32) {
    %c0_i32 = arith.constant 0 : i32
    %c0_i32_0 = arith.constant 0 : i32
    %c0_i32_1 = arith.constant 0 : i32
    return %c0_i32, %c0_i32_0 : i32, i32
  }
  func.func @transform_3(%arg0: i32) -> i32 {
    %c0_i32 = arith.constant 0 : i32
    %c0_i32_0 = arith.constant 0 : i32
    return %c0_i32 : i32
  }
  func.func @transform_4(%arg0: i32) -> (i32, i32, i32) {
    %c0_i32 = arith.constant 0 : i32
    %c0_i32_0 = arith.constant 0 : i32
    %c0_i32_1 = arith.constant 0 : i32
    return %c0_i32, %arg0, %c0_i32_0 : i32, i32, i32
  }
  func.func @transform_5(%arg0: i32) -> (i32, i32, i32) {
    %c0_i32 = arith.constant 0 : i32
    %c0_i32_0 = arith.constant 0 : i32
    %c0_i32_1 = arith.constant 0 : i32
    return %c0_i32, %arg0, %c0_i32_0 : i32, i32, i32
  }
}

</mosaic_0001>

<bundles_post_ra>
// kernel: net_forward_t.1
= control target key start
LH: loop header
LB: loop body
LE: loop exit
PB: predicated region body
PF: predicated region fallthrough
CT: control target
= control target key end

     0   :  { %11 = vsyncpa [#allocation5], 0  ;;  %s562_s0 = inlined_call_operand.vmem [shape: f32[8,3], index: 0, kind: input, shape index: {}]   ;;  %s563_s1 = inlined_call_operand.vmem [shape: f32[8], index: 1, kind: input, shape index: {}]   ;;  %s564_s2 = inlined_call_operand.vmem [shape: f32[1,8], index: 2, kind: input, shape index: {}]   ;;  %s565_s3 = inlined_call_operand.<no memory space> [shape: f32[1], index: 3, kind: input, shape index: {}]   ;;  %s566_s4 = inlined_call_operand.vmem [shape: f32[3,8,128], index: 4, kind: input, shape index: {}]   ;;  %s567_s5 = inlined_call_operand.hbm [shape: f32[1,8,128], index: 5, kind: output, shape index: {}]  }
   0x1   :  { %12 = vsyncpa [#allocation7], 0  ;;  %s30_s20 = sshll.u32 %s563_s1, 4  ;;  %s31_s20 = int_to_ptr.vmem [resolvable:$true] %s30_s20 }
   0x2   :  { %13 = vsyncpa [#allocation4], 0  ;;  %s20_s23 = sshll.u32 %s562_s0, 4  ;;  %s317_s24 = scalar_lea.vmem %s31_s20, 16  ;;  %s21_s23 = int_to_ptr.vmem [resolvable:$true] %s20_s23 }
   0x3   :  { %p318_p0 = scmp.ne.s32.totalorder %s31_s20, %s317_s24  ;;  %p322_p1 = scmp.lt.s32.totalorder %s31_s20, %s31_s20 }
   0x4   :  { %p323_p2 = scmp.lt.s32.totalorder %s317_s24, %s317_s24 }
   0x6   :  { %p324_p3 = por %p323_p2, %p322_p1 }
   0x8   :  { %p325_p4 = pnand %p324_p3, %p318_p0 }
   0xa   :  { %328 = shalt.err (!%p325_p4)
}
   0xb   :  { %s381_s25 = smov [#allocation6]   ;;  %s329_s26 = scalar_lea.vmem %s21_s23, 128 }
   0xc   :  { %33 = dma.vmem_to_smem %s31_s20, 16, %s381_s25, [#allocation7]  }
   0xd   :  { %p330_p5 = scmp.ne.s32.totalorder %s21_s23, %s329_s26  ;;  %p334_p6 = scmp.lt.s32.totalorder %s21_s23, %s21_s23 }
   0xe   :  { %p335_p7 = scmp.lt.s32.totalorder %s329_s26, %s329_s26 }
  0x10   :  { %p336_p8 = por %p335_p7, %p334_p6 }
  0x12   :  { %p337_p9 = pnand %p336_p8, %p330_p5 }
  0x14   :  { %340 = shalt.err (!%p337_p9)
}
  0x15   :  { %s382_s1 = smov [#allocation3]   ;;  %s40_s28 = sshll.u32 %s564_s2, 4  ;;  %s41_s28 = int_to_ptr.vmem [resolvable:$true] %s40_s28 }
  0x16   :  { %23 = dma.vmem_to_smem %s21_s23, 128, %s382_s1, [#allocation5]  }
  0x17   :  { %s341_s29 = scalar_lea.vmem %s41_s28, 16  ;;  %p346_p11 = scmp.lt.s32.totalorder %s41_s28, %s41_s28 }
  0x18   :  { %p342_p10 = scmp.ne.s32.totalorder %s41_s28, %s341_s29  ;;  %p347_p12 = scmp.lt.s32.totalorder %s341_s29, %s341_s29 }
  0x1a   :  { %p348_p13 = por %p347_p12, %p346_p11 }
  0x1c   :  { %p349_p0 = pnand %p348_p13, %p342_p10 }
  0x1e   :  { %352 = shalt.err (!%p349_p0)
}
  0x1f   :  { %s383_s30 = smov [#allocation8]  }
  0x20   :  { %43 = dma.vmem_to_smem %s41_s28, 16, %s383_s30, [#allocation7]  }
  0x21   :  { %375 = dma.done.wait [#allocation5], 128  }
  0x22   :  { %376 = vsyncadd [#allocation5], 4294967168 }
  0x23   :  { %377 = dma.done.wait [#allocation7], 32  }
  0x24   :  { %378 = vsyncadd [#allocation7], 4294967264 }
  0x25   :  { %57 = sfence }
  0x26   :  { %s59_s6 = sld [smem:[#allocation3]]  ;;  %s259_s7 = sld [smem:[#allocation3 + $0x1]]  ;;  %v429_v0 = vld [vmem:[%s566_s4] sm:$0xff]  ;;  %v434_v1 = vld [vmem:[%s566_s4 + $0x8] sm:$0xff]  ;;  %v441_v2 = vld [vmem:[%s566_s4 + $0x10] sm:$0xff] }
  0x27   :  { %s261_s8 = sld [smem:[#allocation3 + $0x2]]  ;;  %s424_s9 = sld [smem:[#allocation6]] }
  0x28   :  { %s262_s2 = sld [smem:[#allocation3 + $0x80]]  ;;  %s263_s10 = sld [smem:[#allocation3 + $0x81]] }
  0x29   :  { %s264_s11 = sld [smem:[#allocation3 + $0x82]]  ;;  %s436_s16 = sld [smem:[#allocation6 + $0x1]] }
  0x2a   :  { %s267_s19 = sld [smem:[#allocation3 + $0x100]]  ;;  %s268_s20 = sld [smem:[#allocation3 + $0x101]] }
  0x2b   :  { %s443_s21 = sld [smem:[#allocation3 + $0x102]]  ;;  %s449_s23 = sld [smem:[#allocation3 + $0x180]] }
  0x2c   :  { %v60_v3 = vstv %s59_s6  ;;  %v65_v4 = vstv %s259_s7  ;;  %s445_s22 = sld [smem:[#allocation6 + $0x2]]  ;;  %s452_s4 = sld [smem:[#allocation3 + $0x181]] }
  0x2d   :  { %v61_v5 = vmul.f32 %v60_v3, %v429_v0  ;;  %v66_v6 = vmul.f32 %v434_v1, %v65_v4  ;;  %v71_v7 = vstv %s261_s8  ;;  %s454_s24 = sld [smem:[#allocation3 + $0x182]]  ;;  %s457_s25 = sld [smem:[#allocation6 + $0x3]]  ;;  %v75_v14 = vstv %s424_s9 }
  0x2e   :  { %v72_v8 = vmul.f32 %v441_v2, %v71_v7  ;;  %v85_v9 = vstv %s262_s2  ;;  %v88_v12 = vstv %s263_s10  ;;  %s462_s26 = sld [smem:[#allocation3 + $0x200]]  ;;  %s464_s1 = sld [smem:[#allocation3 + $0x201]] }
  0x2f   :  { %v67_v10 = vadd.f32 %v66_v6, %v61_v5  ;;  %v86_v11 = vmul.f32 %v85_v9, %v429_v0  ;;  %v92_v13 = vstv %s264_s11  ;;  %v89_v15 = vmul.f32 %v434_v1, %v88_v12  ;;  %s466_s0 = sld [smem:[#allocation3 + $0x202]]  ;;  %s471_s27 = sld [smem:[#allocation6 + $0x4]] }
  0x30   :  { %v93_v16 = vmul.f32 %v441_v2, %v92_v13  ;;  %v107_v18 = vstv %s267_s19  ;;  %v110_v19 = vstv %s268_s20  ;;  %v96_v25 = vstv %s436_s16  ;;  %s476_s28 = sld [smem:[#allocation3 + $0x280]]  ;;  %s478_s29 = sld [smem:[#allocation3 + $0x281]] }
  0x31   :  { %v73_v17 = vadd.f32 %v72_v8, %v67_v10  ;;  %v90_v20 = vadd.f32 %v89_v15, %v86_v11  ;;  %v108_v21 = vmul.f32 %v107_v18, %v429_v0  ;;  %v111_v22 = vmul.f32 %v434_v1, %v110_v19  ;;  %s482_s30 = sld [smem:[#allocation3 + $0x282]]  ;;  %s487_s6 = sld [smem:[#allocation6 + $0x5]] }
  0x32   :  { %v114_v23 = vstv %s443_s21  ;;  %v118_v27 = vstv %s445_s22  ;;  %v129_v30 = vstv %s449_s23  ;;  %v132_v31 = vstv %s452_s4  ;;  %s490_s7 = sld [smem:[#allocation3 + $0x300]]  ;;  %s492_s8 = sld [smem:[#allocation3 + $0x301]] }
  0x33   :  { %v76_v24 = vadd.f32 %v75_v14, %v73_v17  ;;  %v115_v26 = vmul.f32 %v441_v2, %v114_v23  ;;  %v94_v28 = vadd.f32 %v93_v16, %v90_v20  ;;  %v112_v29 = vadd.f32 %v111_v22, %v108_v21  ;;  %s494_s9 = sld [smem:[#allocation8]]  ;;  %s500_s2 = sld [smem:[#allocation3 + $0x302]] }
  0x34   :  { %v130_v33 = vmul.f32 %v129_v30, %v429_v0  ;;  %v133_v34 = vmul.f32 %v434_v1, %v132_v31  ;;  %v136_v35 = vstv %s454_s24  ;;  %v140_v40 = vstv %s457_s25  ;;  %s502_s10 = sld [smem:[#allocation6 + $0x6]]  ;;  %s506_s11 = sld [smem:[#allocation3 + $0x380]] }
  0x35   :  { %v77_v32 = vmul.f32 0.5, %v76_v24  ;;  %v97_v36 = vadd.f32 %v96_v25, %v94_v28  ;;  %v116_v37 = vadd.f32 %v115_v26, %v112_v29  ;;  %v137_v38 = vmul.f32 %v441_v2, %v136_v35  ;;  %s510_s12 = sld [smem:[#allocation3 + $0x381]]  ;;  %s514_s13 = sld [smem:[#allocation3 + $0x382]] }
  0x36   :  { %v134_v39 = vadd.f32 %v133_v34, %v130_v33  ;;  %v151_v41 = vstv %s462_s26  ;;  %v154_v45 = vstv %s464_s1  ;;  %v158_v48 = vstv %s466_s0  ;;  %s520_s14 = sld [smem:[#allocation8 + $0x1]]  ;;  %s525_s15 = sld [smem:[#allocation6 + $0x7]] }
  0x37   :  { %301 = vtanh.f32 %v77_v32  ;;  %v98_v42 = vmul.f32 0.5, %v97_v36  ;;  %v119_v43 = vadd.f32 %v118_v27, %v116_v37  ;;  %v152_v44 = vmul.f32 %v151_v41, %v429_v0  ;;  %s530_s16 = sld [smem:[#allocation8 + $0x2]]  ;;  %s538_s17 = sld [smem:[#allocation8 + $0x3]] }
  0x38   :  { %v138_v46 = vadd.f32 %v137_v38, %v134_v39  ;;  %v155_v47 = vmul.f32 %v434_v1, %v154_v45  ;;  %v159_v50 = vmul.f32 %v441_v2, %v158_v48  ;;  %v162_v51 = vstv %s471_s27  ;;  %s281_s18 = sld [smem:[#allocation8 + $0x4]]  ;;  %s286_s19 = sld [smem:[#allocation8 + $0x5]] }
  0x39   :  { %303 = vtanh.f32 %v98_v42  ;;  %v120_v49 = vmul.f32 0.5, %v119_v43  ;;  %v173_v54 = vstv %s476_s28  ;;  %v176_v55 = vstv %s478_s29  ;;  %s291_s20 = sld [smem:[#allocation8 + $0x6]]  ;;  %s296_s21 = sld [smem:[#allocation8 + $0x7]] }
  0x3a   :  { %v141_v52 = vadd.f32 %v140_v40, %v138_v46  ;;  %v156_v53 = vadd.f32 %v155_v47, %v152_v44  ;;  %v174_v56 = vmul.f32 %v173_v54, %v429_v0  ;;  %v177_v57 = vmul.f32 %v434_v1, %v176_v55  ;;  %s384_s4 = smov [#allocation9]  }
  0x3b   :  { %305 = vtanh.f32 %v120_v49  ;;  %v180_v58 = vstv %s482_s30  ;;  %v184_v63 = vstv %s487_s6  ;;  %v195_v3 = vstv %s490_s7  ;;  %s248_s24 = sshll.u32 %s384_s4, 4  ;;  %s249_s24 = int_to_ptr.vmem [resolvable:$true] %s248_s24 }
  0x3c   :  { %v142_v59 = vmul.f32 0.5, %v141_v52  ;;  %v160_v60 = vadd.f32 %v159_v50, %v156_v53  ;;  %v181_v61 = vmul.f32 %v441_v2, %v180_v58  ;;  %v178_v62 = vadd.f32 %v177_v57, %v174_v56  ;;  %s353_s25 = scalar_lea.vmem %s249_s24, 128  ;;  %p358_p2 = scmp.lt.s32.totalorder %s249_s24, %s249_s24 }
  0x3d   :  { %v198_v4 = vstv %s492_s8  ;;  %v196_v6 = vmul.f32 %v195_v3, %v429_v0  ;;  %v82_v8 = vstv %s494_s9  ;;  %v202_v10 = vstv %s500_s2  ;;  %p354_p1 = scmp.ne.s32.totalorder %s249_s24, %s353_s25  ;;  %p359_p3 = scmp.lt.s32.totalorder %s353_s25, %s353_s25 }
  0x3e   :  { %307 = vtanh.f32 %v142_v59  ;;  %v163_v5 = vadd.f32 %v162_v51, %v160_v60  ;;  %v199_v7 = vmul.f32 %v434_v1, %v198_v4  ;;  %v182_v9 = vadd.f32 %v181_v61, %v178_v62 }
  0x3f   :  { %v206_v11 = vstv %s502_s10  ;;  %v203_v15 = vmul.f32 %v441_v2, %v202_v10  ;;  %v217_v16 = vstv %s506_s11  ;;  %v220_v20 = vstv %s510_s12  ;;  %p360_p4 = por %p359_p3, %p358_p2 }
  0x40   :  { %v164_v13 = vmul.f32 0.5, %v163_v5  ;;  %v200_v14 = vadd.f32 %v199_v7, %v196_v6  ;;  %v185_v18 = vadd.f32 %v184_v63, %v182_v9  ;;  %v218_v19 = vmul.f32 %v217_v16, %v429_v0 }
  0x41   :  { %v302_v12 = vpop.eup %301  ;;  %v221_v22 = vmul.f32 %v434_v1, %v220_v20  ;;  %v224_v23 = vstv %s514_s13  ;;  %v103_v32 = vstv %s520_s14  ;;  %v228_v33 = vstv %s525_s15  ;;  %p361_p5 = pnand %p360_p4, %p354_p1 }
  0x42   :  { %v79_v17 = vmul.f32 0.5, %v302_v12  ;;  %309 = vtanh.f32 %v164_v13  ;;  %v204_v21 = vadd.f32 %v203_v15, %v200_v14  ;;  %v186_v26 = vmul.f32 0.5, %v185_v18 }
  0x43   :  { %v304_v24 = vpop.eup %303  ;;  %v225_v27 = vmul.f32 %v441_v2, %v224_v23  ;;  %v222_v30 = vadd.f32 %v221_v22, %v218_v19  ;;  %v125_v37 = vstv %s530_s16  ;;  %v147_v44 = vstv %s538_s17 }
  0x44   :  { %v80_v25 = vadd.f32 0.5, %v79_v17  ;;  %v100_v28 = vmul.f32 0.5, %v304_v24  ;;  %v207_v29 = vadd.f32 %v206_v11, %v204_v21  ;;  %311 = vtanh.f32 %v186_v26 }
  0x45   :  { %v306_v0 = vpop.eup %305  ;;  %v226_v36 = vadd.f32 %v225_v27, %v222_v30  ;;  %v169_v51 = vstv %s281_s18  ;;  %v191_v57 = vstv %s286_s19  ;;  %v213_v63 = vstv %s291_s20 }
  0x46   :  { %v83_v31 = vmul.f32 %v82_v8, %v80_v25  ;;  %v101_v34 = vadd.f32 0.5, %v100_v28  ;;  %v122_v35 = vmul.f32 0.5, %v306_v0  ;;  %v208_v1 = vmul.f32 0.5, %v207_v29 }
  0x47   :  { %v229_v2 = vadd.f32 %v228_v33, %v226_v36  ;;  %v235_v8 = vstv %s296_s21  ;;  %v239_v12 = vstv %s565_s3 }
  0x48   :  { %v308_v38 = vpop.eup %307  ;;  %v104_v39 = vmul.f32 %v103_v32, %v101_v34  ;;  %v123_v40 = vadd.f32 0.5, %v122_v35  ;;  %313 = vtanh.f32 %v208_v1 }
  0x49   :  { %v144_v41 = vmul.f32 0.5, %v308_v38  ;;  %v230_v45 = vmul.f32 0.5, %v229_v2 }
  0x4a   :  { %v105_v42 = vadd.f32 %v104_v39, %v83_v31  ;;  %v126_v43 = vmul.f32 %v125_v37, %v123_v40 }
  0x4b   :  { %v145_v46 = vadd.f32 0.5, %v144_v41  ;;  %315 = vtanh.f32 %v230_v45 }
  0x4c   :  { %v310_v47 = vpop.eup %309  ;;  %v127_v48 = vadd.f32 %v126_v43, %v105_v42 }
  0x4d   :  { %v148_v49 = vmul.f32 %v147_v44, %v145_v46  ;;  %v166_v50 = vmul.f32 0.5, %v310_v47 }
  0x4e   :  { %v312_v52 = vpop.eup %311 }
  0x4f   :  { %v149_v53 = vadd.f32 %v148_v49, %v127_v48  ;;  %v167_v54 = vadd.f32 0.5, %v166_v50  ;;  %v188_v55 = vmul.f32 0.5, %v312_v52 }
  0x51   :  { %v170_v56 = vmul.f32 %v169_v51, %v167_v54  ;;  %v189_v59 = vadd.f32 0.5, %v188_v55 }
  0x52   :  { %v314_v58 = vpop.eup %313 }
  0x53   :  { %v171_v60 = vadd.f32 %v170_v56, %v149_v53  ;;  %v210_v61 = vmul.f32 0.5, %v314_v58  ;;  %v192_v62 = vmul.f32 %v191_v57, %v189_v59 }
  0x55   :  { %v211_v3 = vadd.f32 0.5, %v210_v61  ;;  %v316_v4 = vpop.eup %315  ;;  %v193_v5 = vadd.f32 %v192_v62, %v171_v60 }
  0x56   :  { %v232_v7 = vmul.f32 0.5, %v316_v4 }
  0x57   :  { %v214_v6 = vmul.f32 %v213_v63, %v211_v3 }
  0x58   :  { %v233_v10 = vadd.f32 0.5, %v232_v7 }
  0x59   :  { %v215_v9 = vadd.f32 %v214_v6, %v193_v5 }
  0x5a   :  { %v236_v11 = vmul.f32 %v235_v8, %v233_v10 }
  0x5c   :  { %v237_v13 = vadd.f32 %v236_v11, %v215_v9 }
  0x5e   :  { %v240_v14 = vadd.f32 %v239_v12, %v237_v13 }
  0x60   :  { %241 = vst [vmem:[#allocation9] sm:$0xff] %v240_v14 }
  0x61   :  { %364 = shalt.err (!%p361_p5)
}
  0x62   :  { %s365_s0 = scalar_lea.hbm %s567_s5, 128 }
  0x63   :  { %p366_p6 = scmp.ne.s32.totalorder %s567_s5, %s365_s0  ;;  %p369_p7 = scmp.lt.u32.totalorder %s365_s0, %s567_s5 }
  0x65   :  { %p371_p8 = pnand %p369_p7, %p366_p6 }
  0x67   :  { %374 = shalt.err (!%p371_p8)
}
  0x68   :  { %251 = dma.vmem_to_hbm [thread:$0]  %s249_s24, 128, %s567_s5, [#allocation4]  }
  0x69   :  { %379 = dma.done.wait [#allocation4], 128  }
  0x6a   :  { %380 = vsyncadd [#allocation4], 4294967168 }
  0x6b   :  { %255 = vsyncpa [#allocation4], 1 }
  0x6c   :  { %256 = vsyncpa [#allocation5], 1 }
  0x6d   :  { %257 = vsyncpa [#allocation7], 1 }

</bundles_post_ra>
